<compile_context>
chip_gen: v7x
topology: tpu7x:2x2x1
jax: 0.10.0
libtpu: 0.0.40
codegen_flags: <defaults>
</compile_context>

<pallas_src>
import jax
import jax.numpy as jnp
from jax.experimental import pallas as pl
from jax.experimental.pallas import tpu as pltpu


def _pool4x4_kernel(s_ref, x_ref, o_ref):
    # s_ref: (cw, cw) f32 -- static 0/1 selection matrix, S[j, d*ncols+p] = (j == 4p+d)
    # x_ref: (tb, 4*wc)   -- each row = the 4 image rows of one pooling row-group
    # o_ref: (tb, ow)     -- pooled output rows
    four_wc = x_ref.shape[1]
    wc = four_wc // 4            # cropped image width
    cw = s_ref.shape[0]          # lane-fold chunk width (min(128, wc)), multiple of 4
    ncols = cw // 4              # pooled columns produced per chunk

    sel = s_ref[...]             # stays VMEM-resident across chunks

    def window_max(col0):
        # 4-row fold: max over the 4 image rows, lanes [col0, col0+cw).
        rm = x_ref[:, pl.ds(col0, cw)]
        for d in range(1, 4):
            rm = jnp.maximum(rm, x_ref[:, pl.ds(d * wc + col0, cw)])
        # 4-column fold: MXU selection gathers candidate d of window p into
        # column d*ncols + p, then a 3-way elementwise max finishes the window.
        cand = jnp.dot(rm.astype(jnp.float32), sel,
                       preferred_element_type=jnp.float32)
        out = cand[:, 0:ncols]
        for d in range(1, 4):
            out = jnp.maximum(out, cand[:, d * ncols:(d + 1) * ncols])
        return out.astype(o_ref.dtype)

    n_full = wc // cw
    for c in range(n_full):
        o_ref[:, pl.ds(c * ncols, ncols)] = window_max(c * cw)
    if wc % cw:
        # Ragged tail: reuse a full-width chunk aligned to the end of the row
        # (overlapping columns are rewritten with identical values).
        o_ref[:, pl.ds((wc - cw) // 4, ncols)] = window_max(wc - cw)


def _pick_rows(m, row_bytes, itemsize):
    """Pooling row-groups per grid step."""
    mult = max(8, 32 // itemsize)        # native sublane packing: 8 f32 / 16 bf16 / 32 int8
    if m <= mult:
        return int(m)                    # single full-extent block (always legal)
    # ~2 MiB of input per block: near the HBM-roofline plateau, and
    # double-buffered it stays far under v5e's 16 MiB default scoped VMEM.
    target = (2 * 1024 * 1024) // max(1, row_bytes)
    tb = max(mult, (target // mult) * mult)
    # Keep >= 4 grid steps so v7x's two TensorCores each get >= 2 pipelined
    # steps (harmless on the single-core v5e / v6e).
    cap = max(mult, ((m // 4) // mult) * mult)
    return int(min(tb, cap))


def _down_block(x):
    n, c, h, w = x.shape
    oh, ow = h // 4, w // 4
    if oh < 1 or ow < 1:
        raise ValueError(f"DownBlock needs H >= 4 and W >= 4, got {(h, w)}")

    # Floor-mode crop.  NOTE: only materializes a copy when H or W is not a
    # multiple of 4 (aligned shapes stream straight from the original buffer).
    if h == 4 * oh and w == 4 * ow:
        xc = x
    else:
        xc = x[:, :, : 4 * oh, : 4 * ow]

    if not jnp.issubdtype(x.dtype, jnp.floating):
        # TODO(synk): integer inputs need a non-MXU lane compaction; use XLA.
        return xc.reshape(n, c, oh, 4, ow, 4).max(axis=(3, 5))

    wc = 4 * ow                       # cropped width
    m = n * c * oh                    # number of pooling row-groups
    x2 = xc.reshape(m, 4 * wc)        # contiguous -> free reshape

    # Static 0/1 selection matrix for the per-chunk lane compaction
    # (constant-folded by XLA; <= 64 KiB, resident in VMEM for the whole grid).
    cw = min(128, wc)
    ncols = cw // 4
    j = jnp.arange(cw)[:, None]
    q = jnp.arange(cw)[None, :]
    sel = (j == 4 * (q % ncols) + q // ncols).astype(jnp.float32)

    itemsize = jnp.dtype(x.dtype).itemsize
    tb = _pick_rows(m, 4 * wc * itemsize, itemsize)
    grid = (pl.cdiv(m, tb),)

    out2 = pl.pallas_call(
        _pool4x4_kernel,
        out_shape=jax.ShapeDtypeStruct((m, ow), x.dtype),
        grid_spec=pltpu.PrefetchScalarGridSpec(
            num_scalar_prefetch=0,
            grid=grid,
            in_specs=[
                # Selection matrix: full-extent block, constant index -> fetched once.
                pl.BlockSpec((cw, cw), lambda i: (0, 0)),
                # Input: sublane-dense rows, full-width lanes, one contiguous DMA per block.
                pl.BlockSpec((tb, 4 * wc), lambda i: (i, 0)),
            ],
            # Output block spans the full pooled width (ow < 128 on small images
            # keeps some store masking -- accepted as a low-priority cost).
            out_specs=pl.BlockSpec((tb, ow), lambda i: (i, 0)),
        ),
        compiler_params=pltpu.CompilerParams(
            dimension_semantics=("parallel",),
        ),
    )(sel, x2)

    return out2.reshape(n, c, oh, ow)


# Jit the wrapper so the free reshapes and (when needed) the crop are handled
# by XLA around the single Pallas pass over the input.
down_block = jax.jit(_down_block)


if __name__ == "__main__":
    key = jax.random.PRNGKey(0)
    x = jax.random.normal(key, (2, 4, 16, 16), dtype=jnp.float32)

    y = jax.block_until_ready(down_block(x))

    assert y.shape == (2, 4, 4, 4), y.shape

    # Reference: two 2x2/stride-2 floor-mode pools == one 4x4/stride-4 pool.
    ref = x.reshape(2, 4, 4, 4, 4, 4).max(axis=(3, 5))
    assert jnp.allclose(y, ref), "mismatch vs reference"

    print("KERNEL_OK")
</pallas_src>

<mosaic_0001>
module attributes {stable_mosaic.version = 11 : i64} {
  func.func @_pool4x4_kernel(%arg0: i32, %arg1: memref<16x16xf32, #tpu.memory_space<vmem>>, %arg2: memref<8x64xf32, #tpu.memory_space<vmem>>, %arg3: memref<8x4xf32, #tpu.memory_space<vmem>>) attributes {dimension_semantics = [#tpu.dimension_semantics<parallel>], iteration_bounds = array<i64: 4>, scalar_prefetch = 0 : i64, scratch_operands = 0 : i64, tpu.core_type = #tpu.core_type<tc>, window_params = [{pipeline_mode = #tpu.pipeline_mode<synchronous>, transform_indices = @transform_0, window_bounds = array<i64: 16, 16>}, {transform_indices = @transform_1, window_bounds = array<i64: 8, 64>}, {transform_indices = @transform_2, window_bounds = array<i64: 8, 4>}]} {
    %c0 = arith.constant 0 : index
    %c0_0 = arith.constant 0 : index
    %0 = vector.load %arg1[%c0, %c0_0] : memref<16x16xf32, #tpu.memory_space<vmem>>, vector<16x16xf32>
    %c0_1 = arith.constant 0 : index
    %c0_2 = arith.constant 0 : index
    %1 = vector.load %arg2[%c0_1, %c0_2] : memref<8x64xf32, #tpu.memory_space<vmem>>, vector<8x16xf32>
    %c0_3 = arith.constant 0 : index
    %c16 = arith.constant 16 : index
    %2 = vector.load %arg2[%c0_3, %c16] : memref<8x64xf32, #tpu.memory_space<vmem>>, vector<8x16xf32>
    %3 = arith.maximumf %1, %2 : vector<8x16xf32>
    %c0_4 = arith.constant 0 : index
    %c32 = arith.constant 32 : index
    %4 = vector.load %arg2[%c0_4, %c32] : memref<8x64xf32, #tpu.memory_space<vmem>>, vector<8x16xf32>
    %5 = arith.maximumf %3, %4 : vector<8x16xf32>
    %c0_5 = arith.constant 0 : index
    %c48 = arith.constant 48 : index
    %6 = vector.load %arg2[%c0_5, %c48] : memref<8x64xf32, #tpu.memory_space<vmem>>, vector<8x16xf32>
    %7 = arith.maximumf %5, %6 : vector<8x16xf32>
    %cst = arith.constant dense<0.000000e+00> : vector<8x16xf32>
    %8 = tpu.matmul %7, %0, %cst {dimension_numbers = #tpu.dot_dimension_numbers<[1], [0], [0], [1], [0, 0, 1, 1], [], []>} : vector<8x16xf32>, vector<16x16xf32>, vector<8x16xf32> -> vector<8x16xf32>
    %9 = vector.extract_strided_slice %8 {offsets = [0, 0], sizes = [8, 4], strides = [1, 1]} : vector<8x16xf32> to vector<8x4xf32>
    %10 = vector.extract_strided_slice %8 {offsets = [0, 4], sizes = [8, 4], strides = [1, 1]} : vector<8x16xf32> to vector<8x4xf32>
    %11 = arith.maximumf %9, %10 : vector<8x4xf32>
    %12 = vector.extract_strided_slice %8 {offsets = [0, 8], sizes = [8, 4], strides = [1, 1]} : vector<8x16xf32> to vector<8x4xf32>
    %13 = arith.maximumf %11, %12 : vector<8x4xf32>
    %14 = vector.extract_strided_slice %8 {offsets = [0, 12], sizes = [8, 4], strides = [1, 1]} : vector<8x16xf32> to vector<8x4xf32>
    %15 = arith.maximumf %13, %14 : vector<8x4xf32>
    %c0_6 = arith.constant 0 : index
    %c0_7 = arith.constant 0 : index
    %16 = vector.load %arg3[%c0_6, %c0_7] : memref<8x4xf32, #tpu.memory_space<vmem>>, vector<8x4xf32>
    tpu.vector_store %arg3[%c0_6, %c0_7], %15 {strides = array<i32>} : memref<8x4xf32, #tpu.memory_space<vmem>>, vector<8x4xf32>,
    return
  }
  func.func @transform_0(%arg0: i32) -> (i32, i32) {
    %c0_i32 = arith.constant 0 : i32
    %c0_i32_0 = arith.constant 0 : i32
    %c0_i32_1 = arith.constant 0 : i32
    return %c0_i32, %c0_i32_0 : i32, i32
  }
  func.func @transform_1(%arg0: i32) -> (i32, i32) {
    %c0_i32 = arith.constant 0 : i32
    %c0_i32_0 = arith.constant 0 : i32
    return %arg0, %c0_i32 : i32, i32
  }
  func.func @transform_2(%arg0: i32) -> (i32, i32) {
    %c0_i32 = arith.constant 0 : i32
    %c0_i32_0 = arith.constant 0 : i32
    return %arg0, %c0_i32 : i32, i32
  }
}

</mosaic_0001>

<bundles_post_ra>
// kernel: _down_block.1
= control target key start
LH: loop header
LB: loop body
LE: loop exit
PB: predicated region body
PF: predicated region fallthrough
CT: control target
= control target key end

     0   :  { %7 = vsyncpa [#allocation3], 0  ;;  %s584_s0 = inlined_call_operand.vmem [shape: f32[16,16], index: 0, kind: input, shape index: {}]   ;;  %s585_s1 = inlined_call_operand.vmem [shape: f32[32,64], index: 1, kind: input, shape index: {}]   ;;  %s586_s2 = inlined_call_operand.hbm [shape: f32[32,4], index: 2, kind: output, shape index: {}]  }
   0x1   :  { %9 = vsyncpa [#allocation3 + $0x1], 0  ;;  %s478_s9 = smov 0   ;;  %s480_s10 = smov 0  }
   0x2   :  { %s482_s11 = smov 0   ;;  %s484_s12 = smov 0  }
   0x3 LB: > { %s499_s13 = sadd.s32 4294967295, %s451_s12   ;;  %s317_s14 = sadd.s32 4294967294, %s451_s12   ;;  %s451_s12 = sphi %s484_s12, %s592_s12   ;;  %s447_s11 = sphi %s482_s11, %s591_s11   ;;  %s443_s10 = sphi %s480_s10, %s590_s10   ;;  %s439_s9 = sphi %s478_s9, %s589_s9  }
   0x4   : > { %s503_s15 = sadd.s32 1, %s451_s12   ;;  %s69_s16 = sadd.s32 1, %s447_s11 }
   0x5   : > { %s66_s17 = ssub.s32 %s451_s12, %s503_s15  ;;  %p79_p0 = scmp.ne.s32.totalorder %s447_s11, %s443_s10 }
   0x6   : > { %p67_p1 = scmp.eq.s32.totalorder %s66_s17, 0  ;;  %p80_p2 = scmp.eq.s32.totalorder %s499_s13, 3 }
   0x7   : > { %p85_p3 = scmp.ne.s32.totalorder %s443_s10, %s439_s9  ;;  %p86_p4 = scmp.eq.s32.totalorder %s317_s14, 3 }
   0x8   : > { %s514_s18 = scalar_select %p67_p1, %s447_s11, %s69_s16  }
   0x9   : > { %p516_p5 = por %p80_p2, %p79_p0  ;;  %p520_p6 = por %p86_p4, %p85_p3 }
   0xa   : > { %p320_p7 = scmp.ge.s32.totalorder %s451_s12, 1  ;;  %p114_p8 = scmp.lt.s32.totalorder %s451_s12, 5 }
   0xc   : > { %p115_p9 = pnand %p320_p7, %p114_p8 }
   0xd   : > { %p135_p10 = scmp.lt.s32.totalorder (!%p115_p9), %s499_s13, 3  ;;  %v139_v0 = vld [vmem:[%s584_s0] sm:$0xff] (!%p115_p9)  ;;  %v140_v1 = vld [vmem:[%s584_s0 + $0x8] sm:$0xff] (!%p115_p9)  ;;  %v453_v2 = vmov (!%p115_p9), 0.0|0.0   ;;  %vm454_vm0 = vmmov (!%p115_p9), 0   ;;  %v455_v4 = vmov (!%p115_p9), 0.0  }
   0xe   : > { %118 = sbr.rel (%p115_p9) target bundleno = 496 (0x1f0), region = 28  ;;  %338 = vmatprep.subr.bf16.mxu0 (!%p115_p9), %v453_v2  ;;  %v339_v3 = vpack.c.bf16 (!%p115_p9), %v140_v1, %v139_v0  ;;  %335 = vmatprep.mubr.msk.f32.mxu0 (!%p115_p9), %vm454_vm0, %v455_v4  ;;  %s456_s30 = smov (!%p115_p9), 112   ;;  %vm155_vm1 = vcmask (!%p115_p9), 130048   ;;  %vm242_vm2 = vcmask (!%p115_p9), 31744  }
   0xf   : > { %s457_s3 = smov (!%p115_p9), 80   ;;  %s458_s4 = smov (!%p115_p9), 96  }
  0x10   : > { %340 = vmatpush3.bf16.msra.mxu0 (!%p115_p9), %v339_v3  ;;  %s459_s5 = smov (!%p115_p9), 120   ;;  %s460_s6 = smov (!%p115_p9), 124  }
  0x11   : > { %s461_s7 = smov (!%p115_p9), 116   ;;  %s132_s8 = sand.u32 (!%p115_p9), 1, %s443_s10  }
  0x12   : > { %s321_s14 = sshll.u32 (!%p115_p9), %s132_s8, 3  ;;  %s325_s16 = sshll.u32 (!%p115_p9), %s499_s13, 7 }
  0x13   : > { %s134_s17 = scalar_lea.vmem (!%p115_p9), [#allocation2], %s321_s14  ;;  %s542_s24 = scalar_lea.hbm (!%p115_p9), %s586_s2, %s325_s16 }
  0x14   : > { %s258_s21 = sshll.u32 (!%p115_p9), %s134_s17, 4  ;;  %s544_s21 = int_to_ptr.vmem [resolvable:$true] %s258_s21 }
  0x15   : > { %s136_s25 = scalar_select %p135_p10, %s499_s13, 3 }
  0x16   : > { %s462_s13 = smov [#allocation2]  }
  0x17   : > { %s322_s26 = sshll.u32 %s136_s25, 3  ;;  %s245_s25 = scalar_lea.sflag [#allocation3], %s132_s8 }
  0x18   : > { %s138_s29 = scalar_lea.vmem %s585_s1, %s322_s26  ;;  %s389_s26 = scalar_lea.vmem %s544_s21, 128 }
  0x19   : > { %v141_v5 = vld [vmem:[%s138_s29] sm:$0xff]  ;;  %p390_p11 = scmp.ne.s32.totalorder %s544_s21, %s389_s26  ;;  %s393_s27 = sshll.u32 %s462_s13, 4  ;;  %s394_s27 = int_to_ptr.vmem [resolvable:$false] %s393_s27 }
  0x1a   : > { %143 = vrot.lane.b32.xlu0 %v141_v5, %s456_s30  ;;  %151 = vrot.lane.b32.xlu1 %v141_v5, %s457_s3  ;;  %s395_s28 = scalar_lea.vmem %s394_s27, 256  ;;  %p396_p0 = scmp.lt.s32.totalorder %s544_s21, %s394_s27 }
  0x1b   : > { %p391_p12 = pnand %p390_p11, %p516_p5  ;;  %p397_p1 = scmp.lt.s32.totalorder %s395_s28, %s389_s26 }
  0x1d   : > { %p392_p13 = pneg %p391_p12  ;;  %p398_p2 = por %p397_p1, %p396_p0 }
  0x1e   : > { %147 = vrot.lane.b32.xlu0 %v141_v5, %s458_s4 }
  0x1f   : > { %p399_p3 = pnand %p398_p2, %p392_p13 }
  0x8c   : > { %v144_v6 = vpop.permute.xlu0 %143  ;;  %v152_v9 = vpop.permute.xlu1 %151 }
  0x8d   : > { %v146_v7 = vmax.f32 %v141_v5, %v144_v6 }
  0x90   : > { %v148_v8 = vpop.permute.xlu0 %147 }
  0x91   : > { %v150_v10 = vmax.f32 %v146_v7, %v148_v8 }
  0x93   : > { %v154_v11 = vmax.f32 %v150_v10, %v152_v9 }
  0x95   : > { %336 = vmatmul.mubr.msk.f32.vlgmr.msra.gmra.mrb[0].mxu0 %vm155_vm1, %v154_v11 }
 0x168   : > { %v225_v12 = vpop.f32.mrb[0].mxu0 }
 0x169   : > { %234 = vrot.lane.b32.xlu0 %v225_v12, %s459_s5  ;;  %230 = vrot.lane.b32.xlu1 %v225_v12, %s460_s6  ;;  %v337_v13 = vpop.f32.mrb[1].mxu0 }
 0x16d   : > { %238 = vrot.lane.b32.xlu1 %v225_v12, %s461_s7 }
 0x1db   : > { %v231_v14 = vpop.permute.xlu1 %230  ;;  %v235_v16 = vpop.permute.xlu0 %234 }
 0x1dc   : > { %v233_v15 = vmax.f32 %v225_v12, %v231_v14 }
 0x1de   : > { %v237_v17 = vmax.f32 %v233_v15, %v235_v16 }
 0x1df   : > { %v239_v18 = vpop.permute.xlu1 %238 }
 0x1e0   : > { %v241_v19 = vmax.f32 %v237_v17, %v239_v18 }
 0x1e2   : > { %243 = vst.msk [vmem:[%s134_s17] sm:$0xff] %vm242_vm2, %v241_v19 }
 0x1e3   : > { %402 = shalt.err (!%p399_p3)
}
 0x1e4   : > { %s403_s29 = scalar_lea.hbm %s542_s24, 128  ;;  %s407_s4 = scalar_lea.hbm %s586_s2, 512 }
 0x1e5   : > { %p404_p4 = scmp.ne.s32.totalorder %s542_s24, %s403_s29  ;;  %p408_p9 = scmp.lt.u32.totalorder %s542_s24, %s586_s2 }
 0x1e6   : > { %p409_p10 = scmp.lt.u32.totalorder %s407_s4, %s403_s29  ;;  %p411_p12 = scmp.lt.u32.totalorder %s403_s29, %s542_s24 }
 0x1e7   : > { %p405_p7 = pnand %p404_p4, %p516_p5 }
 0x1e8   : > { %p410_p11 = por %p409_p10, %p408_p9 }
 0x1e9   : > { %p406_p8 = pneg %p405_p7 }
 0x1ea   : > { %p412_p13 = por %p411_p12, %p410_p11 }
 0x1ec   : > { %p413_p0 = pnand %p412_p13, %p406_p8 }
 0x1ee   : > { %416 = shalt.err (!%p413_p0)
}
 0x1ef   : > { %341 = dma.vmem_to_hbm [thread:$0]  (%p516_p5), %s544_s21, 128, %s542_s24, %s245_s25  }
 0x1f0 PF: > { %p347_p1 = scmp.ge.s32.totalorder %s451_s12, 2  ;;  %s270_s7 = sand.u32 1, %s439_s9  }
 0x1f1   : > { %s271_s8 = scalar_lea.sflag [#allocation3], %s270_s7 }
 0x1f2   : > { %p344_p2 = pnand %p347_p1, %p520_p6 }
 0x1f4   : > { %434 = dma.done.wait (!%p344_p2), %s271_s8, 128  }
 0x1f5   : > { %436 = vsyncadd (!%p344_p2), %s271_s8, 4294967168  ;;  %p12_p3 = scmp.ge.s32.totalorder %s503_s15, 6   ;;  %s589_s9 = smov %s443_s10 }
 0x1f6   : > { %s590_s10 = smov %s447_s11  ;;  %s591_s11 = smov %s514_s18 }
 0x1f7   : > { %s592_s12 = smov %s503_s15  ;;  %14 = sbr.rel (!%p12_p3) target bundleno = 3 (0x3), region = 63 }
 0x1fe   :  { %276 = vsyncpa [#allocation3], 1 }
 0x1ff   :  { %278 = vsyncpa [#allocation3 + $0x1], 1 }

</bundles_post_ra>
